<compile_context>
chip_gen: v7x
topology: tpu7x:2x2x1
jax: 0.10.0
libtpu: 0.0.40
codegen_flags: <defaults>
</compile_context>

<pallas_src>
import functools

import jax
import jax.numpy as jnp
from jax.experimental import pallas as pl
from jax.experimental.pallas import tpu as pltpu

_SELU_ALPHA = 1.6732632423543772
_SELU_SCALE = 1.0507009873554804

# Sublane packing per element size (f32: 8, bf16: 16, int8/fp8: 32).
_SUBLANE_PACK = {4: 8, 2: 16, 1: 32}

# Lane-dense candidate widths for the flattened elementwise path.
_COL_CANDIDATES = (8192, 4096, 2048, 1024, 512, 256, 128)

# Max lane width of a single block (multiple of 128).
_MAX_COL_TILE = 8192


def _round_up(a, b):
    return (a + b - 1) // b * b


def _default_block_bytes():
    """Chip-aware block-byte target (amortize ~0.35us/step against HBM BW)."""
    try:
        kind = jax.devices()[0].device_kind.lower()
    except Exception:  # pragma: no cover - defensive
        return 2 << 20
    if "v7" in kind or "v6" in kind:
        return 4 << 20   # 4 MiB: 4x(in+out) = 16 MiB, inside 32 MiB scoped default
    return 2 << 20       # v5e / unknown: stay well inside the 16 MiB default


def _vmem_limit(block_bytes):
    # in + out, double-buffered, plus headroom; clamp to a range that is safe
    # on every generation (v5e/v6e physical 128 MiB, v7x physical 64 MiB/TC).
    return int(min(max(4 * block_bytes + (8 << 20), 32 << 20), 64 << 20))


# --------------------------------------------------------------------------
# Kernels
# --------------------------------------------------------------------------
def _act_kernel(x_ref, o_ref, *, relu_type):
    x = x_ref[...]
    if relu_type == "relu":
        y = jnp.maximum(x, 0)
    elif relu_type == "leakyrelu":
        y = jnp.where(x >= 0, x, 0.2 * x)
    elif relu_type == "selu":
        xf = x.astype(jnp.float32)
        y = _SELU_SCALE * jnp.where(xf >= 0, xf, _SELU_ALPHA * jnp.expm1(xf))
    else:  # pragma: no cover - validated in the wrapper
        raise ValueError(f"Relu type {relu_type} not supported in this kernel.")
    o_ref[...] = y.astype(o_ref.dtype)


def _prelu_kernel(x_ref, a_ref, o_ref):
    # x_ref: (row_tile, col_tile) block of the (N*C, H*W) view.
    # a_ref: (row_tile, 1) f32 per-row slope (precomputed; no in-kernel one-hot).
    x = x_ref[...]
    a = a_ref[...].astype(x.dtype)        # tiny (row_tile, 1) cast only
    o_ref[...] = jnp.where(x >= 0, x, a * x).astype(o_ref.dtype)


def _act_jnp(x, relu_type):
    """Plain-jnp fallback, used only for <128-element misaligned tails."""
    if relu_type == "relu":
        return jnp.maximum(x, 0)
    if relu_type == "leakyrelu":
        return jnp.where(x >= 0, x, 0.2 * x).astype(x.dtype)
    if relu_type == "selu":
        xf = x.astype(jnp.float32)
        y = _SELU_SCALE * jnp.where(xf >= 0, xf, _SELU_ALPHA * jnp.expm1(xf))
        return y.astype(x.dtype)
    raise ValueError(relu_type)


# --------------------------------------------------------------------------
# Wrappers
# --------------------------------------------------------------------------
def _pick_row_tile(rows, bytes_per_row, target_block_bytes, sub):
    """Row tile: multiple of the sublane pack, >=2 grid steps when possible."""
    row_tile = max(sub, (target_block_bytes // bytes_per_row) // sub * sub)
    if rows > sub:
        # v7x megacore: keep at least 2 grid steps so both TensorCores get work.
        row_tile = min(row_tile, max(sub, _round_up(pl.cdiv(rows, 2), sub)))
    if rows <= row_tile:
        row_tile = rows            # single full-extent block (always legal)
    return row_tile


def _run_elementwise(x2, relu_type, target_block_bytes):
    rows, cols = x2.shape
    dtype = x2.dtype
    itemsize = jnp.dtype(dtype).itemsize
    sub = _SUBLANE_PACK.get(itemsize, 8)

    row_tile = _pick_row_tile(rows, cols * itemsize, target_block_bytes, sub)
    grid = (pl.cdiv(rows, row_tile),)          # partial last block handled by Pallas
    spec = pl.BlockSpec((row_tile, cols), lambda i: (i, 0))
    block_bytes = row_tile * cols * itemsize

    return pl.pallas_call(
        functools.partial(_act_kernel, relu_type=relu_type),
        out_shape=jax.ShapeDtypeStruct((rows, cols), dtype),
        grid=grid,
        in_specs=[spec],
        out_specs=spec,
        compiler_params=pltpu.CompilerParams(
            dimension_semantics=("parallel",),
            vmem_limit_bytes=_vmem_limit(block_bytes)),
    )(x2)


def _elementwise_forward(x, relu_type, target_block_bytes):
    orig_shape = x.shape
    total = x.size
    x_flat = x.reshape(-1)

    cols = next((c for c in _COL_CANDIDATES if total % c == 0), None)
    if cols is not None:
        # Zero-copy lane-dense view of the whole tensor.
        rows = total // cols
        y2 = _run_elementwise(x_flat.reshape(rows, cols), relu_type,
                              target_block_bytes)
        return y2.reshape(orig_shape)

    # Misaligned element count: kernel on the 128-aligned bulk, tiny jnp tail.
    bulk = (total // 128) * 128
    if bulk == 0:
        return _act_jnp(x_flat, relu_type).reshape(orig_shape)
    cols = next(c for c in _COL_CANDIDATES if bulk % c == 0)
    rows = bulk // cols
    y_bulk = _run_elementwise(x_flat[:bulk].reshape(rows, cols), relu_type,
                              target_block_bytes).reshape(-1)
    y_tail = _act_jnp(x_flat[bulk:], relu_type)
    return jnp.concatenate([y_bulk, y_tail]).reshape(orig_shape)


def _prelu_forward(x, prelu_weight, target_block_bytes):
    n, c, h, w = x.shape
    assert prelu_weight is not None and prelu_weight.shape == (c,), (
        "prelu requires a per-channel weight of shape (C,)")
    dtype = x.dtype
    itemsize = jnp.dtype(dtype).itemsize
    sub = _SUBLANE_PACK.get(itemsize, 8)

    rows, cols = n * c, h * w                       # channel identity per row
    x2 = x.reshape(rows, cols)                      # free reshape
    # Tiny (rows, 1) per-row slope, precomputed: row r -> weight[r % C].
    a_rows = jnp.tile(prelu_weight.astype(jnp.float32), n).reshape(rows, 1)

    # Column (lane) tile.
    if cols <= _MAX_COL_TILE:
        col_tile = cols                             # full width (legal for any cols)
    elif cols % 128 == 0:
        col_tile = next((ct for ct in range(_MAX_COL_TILE, 127, -128)
                         if cols % ct == 0), _MAX_COL_TILE)
    else:
        # TODO(synk): non-128-multiple huge H*W -> masked partial last col block.
        col_tile = _MAX_COL_TILE

    row_tile = _pick_row_tile(rows, col_tile * itemsize, target_block_bytes, sub)
    grid = (pl.cdiv(rows, row_tile), pl.cdiv(cols, col_tile))
    x_spec = pl.BlockSpec((row_tile, col_tile), lambda i, j: (i, j))
    a_spec = pl.BlockSpec((row_tile, 1), lambda i, j: (i, 0))  # tiny, col-invariant
    block_bytes = row_tile * col_tile * itemsize

    y2 = pl.pallas_call(
        _prelu_kernel,
        out_shape=jax.ShapeDtypeStruct((rows, cols), dtype),
        grid=grid,
        in_specs=[x_spec, a_spec],
        out_specs=x_spec,
        compiler_params=pltpu.CompilerParams(
            dimension_semantics=("parallel", "parallel"),
            vmem_limit_bytes=_vmem_limit(block_bytes)),
    )(x2, a_rows)
    return y2.reshape(n, c, h, w)


def relu_layer(x, relu_type="relu", prelu_weight=None, target_block_bytes=None):
    """ReluLayer forward. x: (N, C, H, W)."""
    relu_type = relu_type.lower()
    if target_block_bytes is None:
        target_block_bytes = _default_block_bytes()
    if relu_type == "none":
        # Direct pass (value-identical to `x * 1.0`); no HBM round trip.
        return x
    if relu_type == "prelu":
        return _prelu_forward(x, prelu_weight, target_block_bytes)
    if relu_type in ("relu", "leakyrelu", "selu"):
        return _elementwise_forward(x, relu_type, target_block_bytes)
    raise ValueError(f"Relu type {relu_type} not supported.")


# --------------------------------------------------------------------------
# Reference + self-test
# --------------------------------------------------------------------------
def _reference(x, relu_type, prelu_weight=None):
    relu_type = relu_type.lower()
    if relu_type == "relu":
        return jnp.maximum(x, 0.0)
    if relu_type == "leakyrelu":
        return jnp.where(x >= 0.0, x, 0.2 * x)
    if relu_type == "prelu":
        a = prelu_weight.reshape(1, -1, 1, 1)
        return jnp.where(x >= 0.0, x, a * x)
    if relu_type == "selu":
        return jax.nn.selu(x)
    if relu_type == "none":
        return x * 1.0
    raise ValueError(relu_type)


if __name__ == "__main__":
    ok = True

    def _check(tag, y, y_ref):
        global ok
        y = jax.block_until_ready(y)
        if not jnp.allclose(y, y_ref, atol=1e-5, rtol=1e-5):
            ok = False
            print(f"MISMATCH for {tag}")

    # Primary check: module-consistent small shape.
    key = jax.random.PRNGKey(0)
    N, C, H, W = 2, 4, 16, 16
    x = jax.random.normal(key, (N, C, H, W), dtype=jnp.float32)
    prelu_w = jnp.full((C,), 0.25, dtype=jnp.float32)  # nn.PReLU default init

    for rt in ["relu", "leakyrelu", "prelu", "selu", "none"]:
        w = prelu_w if rt == "prelu" else None
        _check(rt, relu_layer(x, rt, prelu_weight=w),
               _reference(x, rt, prelu_weight=w))

    # Multi-block PReLU (small block target forces a >1-step row grid with
    # varying per-block channel offsets: row_tile=8, C=3).
    x2 = jax.random.normal(jax.random.PRNGKey(1), (8, 3, 32, 32), dtype=jnp.float32)
    w2 = jnp.array([0.1, 0.25, 0.5], dtype=jnp.float32)
    _check("prelu_multiblock",
           relu_layer(x2, "prelu", prelu_weight=w2, target_block_bytes=32 * 1024),
           _reference(x2, "prelu", prelu_weight=w2))

    # Column-tiled PReLU (H*W > max col tile -> 2-D grid).
    x4 = jax.random.normal(jax.random.PRNGKey(3), (1, 4, 256, 256), dtype=jnp.float32)
    w4 = jnp.array([0.05, 0.1, 0.25, 0.4], dtype=jnp.float32)
    _check("prelu_coltiled",
           relu_layer(x4, "prelu", prelu_weight=w4, target_block_bytes=256 * 1024),
           _reference(x4, "prelu", prelu_weight=w4))

    # Misaligned element count (not a multiple of 128): bulk kernel + jnp tail.
    x3 = jax.random.normal(jax.random.PRNGKey(2), (2, 3, 5, 7), dtype=jnp.float32)
    for rt in ["relu", "leakyrelu", "selu"]:
        _check(f"{rt}_tail", relu_layer(x3, rt), _reference(x3, rt))
    # Misaligned-H*W PReLU (full-width masked-store fallback path).
    w3 = jnp.array([0.1, 0.2, 0.3], dtype=jnp.float32)
    _check("prelu_tail", relu_layer(x3, "prelu", prelu_weight=w3),
           _reference(x3, "prelu", prelu_weight=w3))

    if ok:
        print("KERNEL_OK")
</pallas_src>

<mosaic_0001>
module attributes {stable_mosaic.version = 11 : i64} {
  func.func @_act_kernel(%arg0: i32, %arg1: memref<1x2048xf32, #tpu.memory_space<vmem>>, %arg2: memref<1x2048xf32, #tpu.memory_space<vmem>>) attributes {dimension_semantics = [#tpu.dimension_semantics<parallel>], iteration_bounds = array<i64: 1>, scalar_prefetch = 0 : i64, scratch_operands = 0 : i64, tpu.core_type = #tpu.core_type<tc>, window_params = [{transform_indices = @transform_0, window_bounds = array<i64: 1, 2048>}, {transform_indices = @transform_1, window_bounds = array<i64: 1, 2048>}]} {
    %c0 = arith.constant 0 : index
    %c0_0 = arith.constant 0 : index
    %0 = vector.load %arg1[%c0, %c0_0] : memref<1x2048xf32, #tpu.memory_space<vmem>>, vector<1x2048xf32>
    %cst = arith.constant 0.000000e+00 : f32
    %1 = vector.broadcast %cst : f32 to vector<1x2048xf32>
    %2 = arith.maximumf %0, %1 : vector<1x2048xf32>
    %c0_1 = arith.constant 0 : index
    %c0_2 = arith.constant 0 : index
    %3 = vector.load %arg2[%c0_1, %c0_2] : memref<1x2048xf32, #tpu.memory_space<vmem>>, vector<1x2048xf32>
    tpu.vector_store %arg2[%c0_1, %c0_2], %2 {strides = array<i32>} : memref<1x2048xf32, #tpu.memory_space<vmem>>, vector<1x2048xf32>,
    return
  }
  func.func @transform_0(%arg0: i32) -> (i32, i32) {
    %c0_i32 = arith.constant 0 : i32
    %c0_i32_0 = arith.constant 0 : i32
    return %arg0, %c0_i32 : i32, i32
  }
  func.func @transform_1(%arg0: i32) -> (i32, i32) {
    %c0_i32 = arith.constant 0 : i32
    %c0_i32_0 = arith.constant 0 : i32
    return %arg0, %c0_i32 : i32, i32
  }
}

</mosaic_0001>

<bundles_post_ra>
// kernel: tpu_custom_call.1
= control target key start
LH: loop header
LB: loop body
LE: loop exit
PB: predicated region body
PF: predicated region fallthrough
CT: control target
= control target key end

     0   :  { %6 = vsyncpa [#allocation3], 0  ;;  %s128_s0 = inlined_call_operand.hbm [shape: f32[1,2048], index: 0, kind: input, shape index: {}]   ;;  %s129_s1 = inlined_call_operand.hbm [shape: f32[1,2048], index: 1, kind: output, shape index: {}]  }
   0x1   :  { %7 = vsyncpa [#allocation4], 0  ;;  %s92_s6 = smov [#allocation2]   ;;  %s44_s10 = scalar_lea.hbm %s128_s0, 256 }
   0x2   :  { %s14_s7 = sshll.u32 %s92_s6, 4  ;;  %p45_p0 = scmp.ne.s32.totalorder %s128_s0, %s44_s10  ;;  %s15_s7 = int_to_ptr.vmem [resolvable:$true] %s14_s7 }
   0x3   :  { %p48_p1 = scmp.lt.u32.totalorder %s44_s10, %s128_s0 }
   0x5   :  { %p50_p2 = pnand %p48_p1, %p45_p0 }
   0x7   :  { %53 = shalt.err (!%p50_p2)
}
   0x8   :  { %s54_s15 = scalar_lea.vmem %s15_s7, 256  ;;  %p59_p4 = scmp.lt.s32.totalorder %s15_s7, %s15_s7 }
   0x9   :  { %p55_p3 = scmp.ne.s32.totalorder %s15_s7, %s54_s15  ;;  %p60_p5 = scmp.lt.s32.totalorder %s54_s15, %s54_s15 }
   0xb   :  { %p61_p6 = por %p60_p5, %p59_p4 }
   0xd   :  { %p62_p7 = pnand %p61_p6, %p55_p3 }
   0xf   :  { %65 = shalt.err (!%p62_p7)
}
  0x10   :  { %17 = dma.hbm_to_vmem [thread:$0]  %s128_s0, 256, %s15_s7, [#allocation3]  }
  0x11   :  { %88 = dma.done.wait [#allocation3], 256  }
  0x12   :  { %89 = vsyncadd [#allocation3], 4294967040  ;;  %s93_s18 = smov [#allocation5]   ;;  %v21_v0 = vld [vmem:[#allocation2] sm:$0xff]  ;;  %v22_v1 = vld [vmem:[#allocation2 + $0x8] sm:$0xff] }
  0x13   :  { %s33_s19 = sshll.u32 %s93_s18, 4  ;;  %v23_v2 = vmax.f32 %v21_v0, 0.0  ;;  %v24_v3 = vmax.f32 %v22_v1, 0.0  ;;  %s34_s19 = int_to_ptr.vmem [resolvable:$true] %s33_s19 }
  0x14   :  { %s66_s20 = scalar_lea.vmem %s34_s19, 256  ;;  %p71_p9 = scmp.lt.s32.totalorder %s34_s19, %s34_s19 }
  0x15   :  { %25 = vst [vmem:[#allocation5] sm:$0xff] %v23_v2  ;;  %26 = vst [vmem:[#allocation5 + $0x8] sm:$0xff] %v24_v3  ;;  %p67_p8 = scmp.ne.s32.totalorder %s34_s19, %s66_s20  ;;  %p72_p10 = scmp.lt.s32.totalorder %s66_s20, %s66_s20 }
  0x17   :  { %p73_p11 = por %p72_p10, %p71_p9 }
  0x19   :  { %p74_p12 = pnand %p73_p11, %p67_p8 }
  0x1b   :  { %77 = shalt.err (!%p74_p12)
}
  0x1c   :  { %s78_s22 = scalar_lea.hbm %s129_s1, 256 }
  0x1d   :  { %p79_p13 = scmp.ne.s32.totalorder %s129_s1, %s78_s22  ;;  %p82_p0 = scmp.lt.u32.totalorder %s78_s22, %s129_s1 }
  0x1f   :  { %p84_p1 = pnand %p82_p0, %p79_p13 }
  0x21   :  { %87 = shalt.err (!%p84_p1)
}
  0x22   :  { %36 = dma.vmem_to_hbm [thread:$0]  %s34_s19, 256, %s129_s1, [#allocation4]  }
  0x23   :  { %90 = dma.done.wait [#allocation4], 256  }
  0x24   :  { %91 = vsyncadd [#allocation4], 4294967040 }
  0x25   :  { %40 = vsyncpa [#allocation3], 1 }
  0x26   :  { %41 = vsyncpa [#allocation4], 1 }

</bundles_post_ra>
